<compile_context>
chip_gen: v6e
topology: v6e:2x2x1
jax: 0.10.0
libtpu: 0.0.40
codegen_flags: <defaults>
</compile_context>

<pallas_src>
import functools

import numpy as np
import jax
import jax.numpy as jnp
from jax import lax
from jax.experimental import pallas as pl
from jax.experimental.pallas import tpu as pltpu


# ----------------------------- Pallas kernel ------------------------------- #

def _encoder_block_kernel(
    x_ref,        # (1, C, BL)       packed input slab (lanes = batch-major, length-minor)
    seg_ref,      # (BL, Bt)         0/1 segment matrix  (lane -> batch element)
    segt_ref,     # (Bt, BL)         its transpose       (batch element -> lanes)
    gmat_ref,     # (C, C)           0/1 group membership (used iff cpg > 1)
    cmask_ref,    # (K,  BL)         per-tap validity masks for the 'same' convs
    pmask_ref,    # (Kp, BL)         per-tap validity masks for the pool conv
    aff_ref,      # (C, 8)           [g1 b1 g2 b2 bc1 bc2 0 0] per-channel params
    w1_ref,       # (C, K*CP)        conv1 stacked weights
    w2_ref,       # (C, K*CP)        conv2 stacked weights
    wp_ref,       # (Cout, Kp*CP)    pool conv stacked weights
    bp_ref,       # (Cout, 1)        pool conv bias
    out_ref,      # (1, Cout, BL)    stride-1 aligned pool conv output
    pad_ref,      # (C, BL + H)      scratch: halo'd activation buffer (shared)
    cols_ref,     # (K*CP, BL)       scratch: conv im2col slab (shared by conv1/conv2)
    pcols_ref,    # (Kp*CP, BL)      scratch: pool im2col slab
    *, K, Kp, CP, left_same, left_pool, cpg, L, eps,
):
    f32 = jnp.float32
    C, BL = x_ref.shape[1], x_ref.shape[2]

    # Only the sublane-alignment rows of the im2col slabs (they exist only when
    # C % 8 != 0) need to be exact zeros; everything else the matmuls read is
    # rewritten every step, so no pl.when(step==0) init is needed and the kernel
    # stays correct when the "parallel" grid axis is sharded across cores.
    if CP != C:
        cols_ref[...] = jnp.zeros_like(cols_ref)
        pcols_ref[...] = jnp.zeros_like(pcols_ref)

    x = x_ref[0].astype(f32)                            # (C, BL)
    aff = aff_ref[...].astype(f32)                      # (C, 8)
    g1, b1 = aff[:, 0:1], aff[:, 1:2]
    g2, b2 = aff[:, 2:3], aff[:, 3:4]
    bc1, bc2 = aff[:, 4:5], aff[:, 5:6]

    inv_n = 1.0 / float(cpg * L)

    def group_norm(v, gamma, beta):
        # Per-(batch, group) statistics on the packed slab via small 0/1 matmuls:
        #   per-segment lane sums : (C, BL) @ (BL, Bt) -> (C, Bt)
        #   group aggregation     : (C, C)  @ (C, Bt)  -> (C, Bt)   (skip if cpg == 1)
        #   broadcast back        : (C, Bt) @ (Bt, BL) -> (C, BL)
        def seg_stat(t):
            s = jnp.dot(t, seg_ref[...], preferred_element_type=f32)
            if cpg > 1:
                s = jnp.dot(gmat_ref[...], s, preferred_element_type=f32)
            return jnp.dot(s * inv_n, segt_ref[...], preferred_element_type=f32)

        mean = seg_stat(v)
        c = v - mean
        var = seg_stat(c * c)                            # two-pass variance
        return c * lax.rsqrt(var + eps) * gamma + beta

    def silu(v):
        return v * (1.0 / (1.0 + jnp.exp(-v)))           # exact sigmoid; exp on the EUP

    def conv(h, w_ref_, bias, K_, left_, mask_ref, cref):
        # One fat MXU matmul per conv: assemble the im2col slab (K_*CP, BL) from
        # contiguous lane slices of the halo'd buffer; the per-tap select masks
        # zero the per-segment 'same' padding, the halo and any stale content.
        pad_ref[:, pl.ds(left_, BL)] = h
        for k in range(K_):                               # static, tiny
            tap = pad_ref[:, pl.ds(k, BL)]
            mrow = jnp.broadcast_to(mask_ref[pl.ds(k, 1), :], tap.shape)
            cref[pl.ds(k * CP, C), :] = jnp.where(mrow > 0.5, tap, 0.0)
        return jnp.dot(w_ref_[...], cref[...], preferred_element_type=f32) + bias

    h = silu(group_norm(x, g1, b1))
    h = conv(h, w1_ref, bc1, K, left_same, cmask_ref, cols_ref)
    h = silu(group_norm(h, g2, b2))
    # TODO(synk): nn.Dropout(p=0.15) is identity in eval mode; training-mode RNG mask not implemented.
    h = conv(h, w2_ref, bc2, K, left_same, cmask_ref, cols_ref) + x       # residual
    o = conv(h, wp_ref, bp_ref[...], Kp, left_pool, pmask_ref, pcols_ref)
    out_ref[0] = o.astype(out_ref.dtype)


# ------------------------------ host helpers ------------------------------- #

def _round_up(n, m):
    return (n + m - 1) // m * m


def _stack_conv_weights(w, cp):
    """PyTorch Conv1d weight (O, I, K) -> (O, K*cp) with [o, k*cp + i] = w[o, i, k]."""
    O, I, Kk = w.shape
    wt = jnp.transpose(w, (0, 2, 1))                      # (O, K, I)
    wt = jnp.pad(wt, ((0, 0), (0, 0), (0, cp - I)))       # (O, K, cp)
    return wt.reshape(O, Kk * cp).astype(jnp.float32)


def _choose_b_tile(B, L, *, target_lanes=512, max_lanes=4096):
    """Largest batch tile whose packed lane width is dense but VMEM-modest."""
    divisors = [d for d in range(1, B + 1) if B % d == 0]
    ok = [d for d in divisors if d * L <= max_lanes] or [1]
    for d in ok:
        if d * L >= target_lanes:
            return d
    return ok[-1]


def v2_encoder_block_1d(x, params, *, kernel_size, ratio, eps=1e-5):
    B, C, L = x.shape
    K = kernel_size
    Kp = 2 * ratio
    stride = ratio
    Cout = params["wp"].shape[0]
    groups = min(C, 16)
    assert C % groups == 0, "GroupNorm requires C divisible by num_groups"
    cpg = C // groups

    # Padding conventions (match PyTorch Conv1d).
    left_same = (K - 1) // 2
    if ratio == 1:
        left_pool = (Kp - 1) // 2
        right_pool = (Kp - 1) - left_pool
    else:
        left_pool = right_pool = (2 * ratio - 1) // 2
    Lout = (L + left_pool + right_pool - Kp) // stride + 1

    CP = _round_up(C, 8)                    # sublane-aligned channel stride in im2col
    B_tile = _choose_b_tile(B, L)
    nb = B // B_tile
    BL = B_tile * L
    halo = max(K, Kp) - 1

    # ----- host-side layout plumbing (tiny XLA ops) ----- #
    # packed input: (B, C, L) -> (nb, C, B_tile*L); lanes = (batch-major, length-minor)
    xp = x.reshape(nb, B_tile, C, L).transpose(0, 2, 1, 3).reshape(nb, C, BL)

    lane_seg = np.arange(BL) // L
    seg = (lane_seg[:, None] == np.arange(B_tile)[None, :]).astype(np.float32)  # (BL, Bt)
    segt = np.ascontiguousarray(seg.T)                                           # (Bt, BL)

    l_pos = np.arange(BL) % L

    def dest_mask(shift):
        lo, hi = max(0, shift), L + min(0, shift)
        return ((l_pos >= lo) & (l_pos < hi)).astype(np.float32)

    cmask = np.stack([dest_mask(left_same - k) for k in range(K)])    # (K,  BL)
    pmask = np.stack([dest_mask(left_pool - k) for k in range(Kp)])   # (Kp, BL)

    gid = np.arange(C) // cpg
    gmat = (gid[:, None] == gid[None, :]).astype(np.float32)          # (C, C)

    w1s = _stack_conv_weights(params["w1"], CP)                       # (C,    K*CP)
    w2s = _stack_conv_weights(params["w2"], CP)                       # (C,    K*CP)
    wps = _stack_conv_weights(params["wp"], CP)                       # (Cout, Kp*CP)
    zc = jnp.zeros((C,), jnp.float32)
    aff = jnp.stack([params["g1"], params["b1"], params["g2"], params["b2"],
                     params["bc1"], params["bc2"], zc, zc],
                    axis=1).astype(jnp.float32)                       # (C, 8)
    bp = params["bp"].reshape(Cout, 1).astype(jnp.float32)

    kernel = functools.partial(
        _encoder_block_kernel, K=K, Kp=Kp, CP=CP,
        left_same=left_same, left_pool=left_pool, cpg=cpg, L=L, eps=eps)

    def invariant(shape):
        zero = (0,) * len(shape)
        return pl.BlockSpec(shape, lambda i, _z=zero: _z)

    # Advisory cost estimate.
    gn_macs = 2 * (2 * C * BL * B_tile + (C * C * B_tile if cpg > 1 else 0))
    macs = 2 * C * (K * CP) * BL + Cout * (Kp * CP) * BL + 2 * gn_macs
    flops = int(nb * (2 * macs + 40 * C * BL))
    transcendentals = int(nb * 2 * C * BL)
    bytes_accessed = int(4 * (B * C * L + nb * Cout * BL + w1s.size + w2s.size
                              + wps.size + 2 * seg.size + cmask.size + pmask.size
                              + C * C + aff.size + Cout))

    out_packed = pl.pallas_call(
        kernel,
        out_shape=jax.ShapeDtypeStruct((nb, Cout, BL), x.dtype),
        grid=(nb,),
        in_specs=[
            pl.BlockSpec((1, C, BL), lambda i: (i, 0, 0)),    # packed x
            invariant((BL, B_tile)),                          # seg
            invariant((B_tile, BL)),                          # segt
            invariant((C, C)),                                # gmat
            invariant((K, BL)),                               # conv tap masks
            invariant((Kp, BL)),                              # pool tap masks
            invariant((C, 8)),                                # packed affine/bias params
            invariant((C, K * CP)),                           # w1 (stacked)
            invariant((C, K * CP)),                           # w2 (stacked)
            invariant((Cout, Kp * CP)),                       # wp (stacked)
            invariant((Cout, 1)),                             # bp
        ],
        out_specs=pl.BlockSpec((1, Cout, BL), lambda i: (i, 0, 0)),
        scratch_shapes=[
            pltpu.VMEM((C, BL + halo), jnp.float32),          # halo'd activation buffer
            pltpu.VMEM((K * CP, BL), jnp.float32),            # conv im2col slab
            pltpu.VMEM((Kp * CP, BL), jnp.float32),           # pool im2col slab
        ],
        compiler_params=pltpu.CompilerParams(
            dimension_semantics=("parallel",)),
        cost_estimate=pl.CostEstimate(
            flops=flops, transcendentals=transcendentals,
            bytes_accessed=bytes_accessed),
    )(xp, jnp.asarray(seg), jnp.asarray(segt), jnp.asarray(gmat),
      jnp.asarray(cmask), jnp.asarray(pmask), aff, w1s, w2s, wps, bp)

    # Un-pack to (B, Cout, L) and take the strided pool outputs (tiny XLA ops).
    out_full = out_packed.reshape(nb, Cout, B_tile, L).transpose(0, 2, 1, 3)
    out_full = out_full.reshape(B, Cout, L)
    out = out_full[:, :, ::stride][:, :, :Lout]
    assert out.shape == (B, Cout, Lout)
    return out


# ------------------------- pure-JAX reference (check) ---------------------- #

def reference_forward(x, params, *, kernel_size, ratio):
    C = x.shape[1]
    groups = min(C, 16)
    eps = 1e-5

    def group_norm(v, gamma, beta):
        B, Cc, L = v.shape
        vg = v.reshape(B, groups, (Cc // groups) * L)
        mean = vg.mean(-1, keepdims=True)
        var = vg.var(-1, keepdims=True)
        vn = ((vg - mean) * lax.rsqrt(var + eps)).reshape(B, Cc, L)
        return vn * gamma[None, :, None] + beta[None, :, None]

    def silu(v):
        return v * jax.nn.sigmoid(v)

    def conv1d(v, w, b, stride, padding):
        out = lax.conv_general_dilated(
            v, w, window_strides=(stride,), padding=[padding],
            dimension_numbers=("NCH", "OIH", "NCH"))
        return out + b[None, :, None]

    K = kernel_size
    left_same = (K - 1) // 2
    right_same = (K - 1) - left_same

    res = x
    h = group_norm(x, params["g1"], params["b1"])
    h = silu(h)
    h = conv1d(h, params["w1"], params["bc1"], 1, (left_same, right_same))
    h = group_norm(h, params["g2"], params["b2"])
    h = silu(h)
    h = conv1d(h, params["w2"], params["bc2"], 1, (left_same, right_same))
    h = h + res

    Kp = 2 * ratio
    if ratio == 1:
        left = (Kp - 1) // 2
        right = (Kp - 1) - left
    else:
        left = right = (2 * ratio - 1) // 2
    return conv1d(h, params["wp"], params["bp"], ratio, (left, right))


# ---------------------------------- main ----------------------------------- #

if __name__ == "__main__":
    def make_inputs(key, B, C_in, C_out, L, kernel_size, ratio):
        ks = jax.random.split(key, 11)
        x = jax.random.normal(ks[0], (B, C_in, L), jnp.float32)
        params = {
            "g1": 1.0 + 0.1 * jax.random.normal(ks[1], (C_in,), jnp.float32),
            "b1": 0.1 * jax.random.normal(ks[2], (C_in,), jnp.float32),
            "g2": 1.0 + 0.1 * jax.random.normal(ks[3], (C_in,), jnp.float32),
            "b2": 0.1 * jax.random.normal(ks[4], (C_in,), jnp.float32),
            "w1": 0.2 * jax.random.normal(ks[5], (C_in, C_in, kernel_size), jnp.float32),
            "bc1": 0.1 * jax.random.normal(ks[6], (C_in,), jnp.float32),
            "w2": 0.2 * jax.random.normal(ks[7], (C_in, C_in, kernel_size), jnp.float32),
            "bc2": 0.1 * jax.random.normal(ks[8], (C_in,), jnp.float32),
            "wp": 0.2 * jax.random.normal(ks[9], (C_out, C_in, 2 * ratio), jnp.float32),
            "bp": 0.1 * jax.random.normal(ks[10], (C_out,), jnp.float32),
        }
        return x, params

    k1, k2 = jax.random.split(jax.random.PRNGKey(0))

    configs = [
        # (B, C_in, C_out, L, kernel_size, ratio)
        (2, 4, 8, 16, 3, 2),     # downsampling encoder block, cpg=1, CP>C path
        (16, 32, 16, 12, 5, 1),  # ratio=1 ('same' pool), cpg=2 GroupNorm
    ]
    for cfg_key, (B, C_in, C_out, L, ksz, ratio) in zip((k1, k2), configs):
        x, params = make_inputs(cfg_key, B, C_in, C_out, L, ksz, ratio)
        out = v2_encoder_block_1d(x, params, kernel_size=ksz, ratio=ratio)
        out = jax.block_until_ready(out)
        ref = reference_forward(x, params, kernel_size=ksz, ratio=ratio)
        np.testing.assert_allclose(np.asarray(out), np.asarray(ref),
                                   rtol=1e-4, atol=1e-4)

    print("KERNEL_OK")
</pallas_src>

<mosaic_0001>
module attributes {stable_mosaic.version = 11 : i64} {
  func.func @_encoder_block_kernel(%arg0: i32, %arg1: memref<1x4x32xf32, #tpu.memory_space<vmem>>, %arg2: memref<32x2xf32, #tpu.memory_space<vmem>>, %arg3: memref<2x32xf32, #tpu.memory_space<vmem>>, %arg4: memref<4x4xf32, #tpu.memory_space<vmem>>, %arg5: memref<3x32xf32, #tpu.memory_space<vmem>>, %arg6: memref<4x32xf32, #tpu.memory_space<vmem>>, %arg7: memref<4x8xf32, #tpu.memory_space<vmem>>, %arg8: memref<4x24xf32, #tpu.memory_space<vmem>>, %arg9: memref<4x24xf32, #tpu.memory_space<vmem>>, %arg10: memref<8x32xf32, #tpu.memory_space<vmem>>, %arg11: memref<8x1xf32, #tpu.memory_space<vmem>>, %arg12: memref<1x8x32xf32, #tpu.memory_space<vmem>>, %arg13: memref<4x35xf32, #tpu.memory_space<vmem>>, %arg14: memref<24x32xf32, #tpu.memory_space<vmem>>, %arg15: memref<32x32xf32, #tpu.memory_space<vmem>>) attributes {dimension_semantics = [#tpu.dimension_semantics<parallel>], iteration_bounds = array<i64: 1>, scalar_prefetch = 0 : i64, scratch_operands = 3 : i64, tpu.core_type = #tpu.core_type<tc>, window_params = [{transform_indices = @transform_0, window_bounds = array<i64: 1, 4, 32>}, {pipeline_mode = #tpu.pipeline_mode<synchronous>, transform_indices = @transform_1, window_bounds = array<i64: 32, 2>}, {pipeline_mode = #tpu.pipeline_mode<synchronous>, transform_indices = @transform_2, window_bounds = array<i64: 2, 32>}, {pipeline_mode = #tpu.pipeline_mode<synchronous>, transform_indices = @transform_3, window_bounds = array<i64: 4, 4>}, {pipeline_mode = #tpu.pipeline_mode<synchronous>, transform_indices = @transform_4, window_bounds = array<i64: 3, 32>}, {pipeline_mode = #tpu.pipeline_mode<synchronous>, transform_indices = @transform_5, window_bounds = array<i64: 4, 32>}, {pipeline_mode = #tpu.pipeline_mode<synchronous>, transform_indices = @transform_6, window_bounds = array<i64: 4, 8>}, {pipeline_mode = #tpu.pipeline_mode<synchronous>, transform_indices = @transform_7, window_bounds = array<i64: 4, 24>}, {pipeline_mode = #tpu.pipeline_mode<synchronous>, transform_indices = @transform_8, window_bounds = array<i64: 4, 24>}, {pipeline_mode = #tpu.pipeline_mode<synchronous>, transform_indices = @transform_9, window_bounds = array<i64: 8, 32>}, {pipeline_mode = #tpu.pipeline_mode<synchronous>, transform_indices = @transform_10, window_bounds = array<i64: 8, 1>}, {transform_indices = @transform_11, window_bounds = array<i64: 1, 8, 32>}]} {
    %cst = arith.constant 0.000000e+00 : f32
    %0 = vector.broadcast %cst : f32 to vector<24x32xf32>
    %c0 = arith.constant 0 : index
    %c0_0 = arith.constant 0 : index
    %1 = vector.load %arg14[%c0, %c0_0] : memref<24x32xf32, #tpu.memory_space<vmem>>, vector<24x32xf32>
    tpu.vector_store %arg14[%c0, %c0_0], %0 {strides = array<i32>} : memref<24x32xf32, #tpu.memory_space<vmem>>, vector<24x32xf32>,
    %cst_1 = arith.constant 0.000000e+00 : f32
    %2 = vector.broadcast %cst_1 : f32 to vector<32x32xf32>
    %c0_2 = arith.constant 0 : index
    %c0_3 = arith.constant 0 : index
    %3 = vector.load %arg15[%c0_2, %c0_3] : memref<32x32xf32, #tpu.memory_space<vmem>>, vector<32x32xf32>
    tpu.vector_store %arg15[%c0_2, %c0_3], %2 {strides = array<i32>} : memref<32x32xf32, #tpu.memory_space<vmem>>, vector<32x32xf32>,
    %c0_4 = arith.constant 0 : index
    %c0_5 = arith.constant 0 : index
    %c0_6 = arith.constant 0 : index
    %4 = vector.load %arg1[%c0_4, %c0_5, %c0_6] : memref<1x4x32xf32, #tpu.memory_space<vmem>>, vector<1x4x32xf32>
    %5 = vector.shape_cast %4 : vector<1x4x32xf32> to vector<4x32xf32>
    %c0_7 = arith.constant 0 : index
    %c0_8 = arith.constant 0 : index
    %6 = vector.load %arg7[%c0_7, %c0_8] : memref<4x8xf32, #tpu.memory_space<vmem>>, vector<4x8xf32>
    %7 = vector.extract_strided_slice %6 {offsets = [0, 0], sizes = [4, 1], strides = [1, 1]} : vector<4x8xf32> to vector<4x1xf32>
    %8 = vector.extract_strided_slice %6 {offsets = [0, 1], sizes = [4, 1], strides = [1, 1]} : vector<4x8xf32> to vector<4x1xf32>
    %9 = vector.extract_strided_slice %6 {offsets = [0, 2], sizes = [4, 1], strides = [1, 1]} : vector<4x8xf32> to vector<4x1xf32>
    %10 = vector.extract_strided_slice %6 {offsets = [0, 3], sizes = [4, 1], strides = [1, 1]} : vector<4x8xf32> to vector<4x1xf32>
    %11 = vector.extract_strided_slice %6 {offsets = [0, 4], sizes = [4, 1], strides = [1, 1]} : vector<4x8xf32> to vector<4x1xf32>
    %12 = vector.extract_strided_slice %6 {offsets = [0, 5], sizes = [4, 1], strides = [1, 1]} : vector<4x8xf32> to vector<4x1xf32>
    %c0_9 = arith.constant 0 : index
    %c0_10 = arith.constant 0 : index
    %13 = vector.load %arg2[%c0_9, %c0_10] : memref<32x2xf32, #tpu.memory_space<vmem>>, vector<32x2xf32>
    %cst_11 = arith.constant dense<0.000000e+00> : vector<4x2xf32>
    %14 = tpu.matmul %5, %13, %cst_11 {dimension_numbers = #tpu.dot_dimension_numbers<[1], [0], [0], [1], [0, 0, 1, 1], [], []>} : vector<4x32xf32>, vector<32x2xf32>, vector<4x2xf32> -> vector<4x2xf32>
    %cst_12 = arith.constant 6.250000e-02 : f32
    %15 = vector.broadcast %cst_12 : f32 to vector<4x2xf32>
    %16 = arith.mulf %14, %15 : vector<4x2xf32>
    %c0_13 = arith.constant 0 : index
    %c0_14 = arith.constant 0 : index
    %17 = vector.load %arg3[%c0_13, %c0_14] : memref<2x32xf32, #tpu.memory_space<vmem>>, vector<2x32xf32>
    %cst_15 = arith.constant dense<0.000000e+00> : vector<4x32xf32>
    %18 = tpu.matmul %16, %17, %cst_15 {dimension_numbers = #tpu.dot_dimension_numbers<[1], [0], [0], [1], [0, 0, 1, 1], [], []>} : vector<4x2xf32>, vector<2x32xf32>, vector<4x32xf32> -> vector<4x32xf32>
    %19 = arith.subf %5, %18 : vector<4x32xf32>
    %20 = arith.mulf %19, %19 : vector<4x32xf32>
    %c0_16 = arith.constant 0 : index
    %c0_17 = arith.constant 0 : index
    %21 = vector.load %arg2[%c0_16, %c0_17] : memref<32x2xf32, #tpu.memory_space<vmem>>, vector<32x2xf32>
    %cst_18 = arith.constant dense<0.000000e+00> : vector<4x2xf32>
    %22 = tpu.matmul %20, %21, %cst_18 {dimension_numbers = #tpu.dot_dimension_numbers<[1], [0], [0], [1], [0, 0, 1, 1], [], []>} : vector<4x32xf32>, vector<32x2xf32>, vector<4x2xf32> -> vector<4x2xf32>
    %cst_19 = arith.constant 6.250000e-02 : f32
    %23 = vector.broadcast %cst_19 : f32 to vector<4x2xf32>
    %24 = arith.mulf %22, %23 : vector<4x2xf32>
    %c0_20 = arith.constant 0 : index
    %c0_21 = arith.constant 0 : index
    %25 = vector.load %arg3[%c0_20, %c0_21] : memref<2x32xf32, #tpu.memory_space<vmem>>, vector<2x32xf32>
    %cst_22 = arith.constant dense<0.000000e+00> : vector<4x32xf32>
    %26 = tpu.matmul %24, %25, %cst_22 {dimension_numbers = #tpu.dot_dimension_numbers<[1], [0], [0], [1], [0, 0, 1, 1], [], []>} : vector<4x2xf32>, vector<2x32xf32>, vector<4x32xf32> -> vector<4x32xf32>
    %cst_23 = arith.constant 9.99999974E-6 : f32
    %27 = vector.broadcast %cst_23 : f32 to vector<4x32xf32>
    %28 = arith.addf %26, %27 : vector<4x32xf32>
    %29 = math.rsqrt %28 : vector<4x32xf32>
    %30 = arith.mulf %19, %29 : vector<4x32xf32>
    %31 = vector.broadcast %7 : vector<4x1xf32> to vector<4x32xf32>
    %32 = arith.mulf %30, %31 : vector<4x32xf32>
    %33 = vector.broadcast %8 : vector<4x1xf32> to vector<4x32xf32>
    %34 = arith.addf %32, %33 : vector<4x32xf32>
    %cst_24 = arith.constant 0.000000e+00 : f32
    %35 = vector.broadcast %cst_24 : f32 to vector<4x32xf32>
    %36 = arith.subf %35, %34 : vector<4x32xf32>
    %37 = math.exp %36 : vector<4x32xf32>
    %cst_25 = arith.constant 1.000000e+00 : f32
    %38 = vector.broadcast %cst_25 : f32 to vector<4x32xf32>
    %39 = arith.addf %38, %37 : vector<4x32xf32>
    %cst_26 = arith.constant 1.000000e+00 : f32
    %40 = vector.broadcast %cst_26 : f32 to vector<4x32xf32>
    %41 = arith.divf %40, %39 : vector<4x32xf32>
    %42 = arith.mulf %34, %41 : vector<4x32xf32>
    %c0_27 = arith.constant 0 : index
    %c1 = arith.constant 1 : index
    %43 = vector.load %arg13[%c0_27, %c1] : memref<4x35xf32, #tpu.memory_space<vmem>>, vector<4x32xf32>
    tpu.vector_store %arg13[%c0_27, %c1], %42 {strides = array<i32>} : memref<4x35xf32, #tpu.memory_space<vmem>>, vector<4x32xf32>,
    %c0_28 = arith.constant 0 : index
    %c0_29 = arith.constant 0 : index
    %44 = vector.load %arg13[%c0_28, %c0_29] : memref<4x35xf32, #tpu.memory_space<vmem>>, vector<4x32xf32>
    %c0_30 = arith.constant 0 : index
    %c0_31 = arith.constant 0 : index
    %45 = vector.load %arg5[%c0_30, %c0_31] : memref<3x32xf32, #tpu.memory_space<vmem>>, vector<1x32xf32>
    %46 = vector.shape_cast %45 : vector<1x32xf32> to vector<1x32xf32>
    %47 = vector.broadcast %46 : vector<1x32xf32> to vector<4x32xf32>
    %cst_32 = arith.constant 5.000000e-01 : f32
    %48 = vector.broadcast %cst_32 : f32 to vector<4x32xf32>
    %49 = arith.cmpf ogt, %47, %48 : vector<4x32xf32>
    %cst_33 = arith.constant 0.000000e+00 : f32
    %50 = vector.broadcast %cst_33 : f32 to vector<4x32xf32>
    %51 = arith.select %49, %44, %50 : vector<4x32xi1>, vector<4x32xf32>
    %c0_34 = arith.constant 0 : index
    %c0_35 = arith.constant 0 : index
    %52 = vector.load %arg14[%c0_34, %c0_35] : memref<24x32xf32, #tpu.memory_space<vmem>>, vector<4x32xf32>
    tpu.vector_store %arg14[%c0_34, %c0_35], %51 {strides = array<i32>} : memref<24x32xf32, #tpu.memory_space<vmem>>, vector<4x32xf32>,
    %c0_36 = arith.constant 0 : index
    %c1_37 = arith.constant 1 : index
    %53 = vector.load %arg13[%c0_36, %c1_37] : memref<4x35xf32, #tpu.memory_space<vmem>>, vector<4x32xf32>
    %c1_38 = arith.constant 1 : index
    %c0_39 = arith.constant 0 : index
    %54 = vector.load %arg5[%c1_38, %c0_39] : memref<3x32xf32, #tpu.memory_space<vmem>>, vector<1x32xf32>
    %55 = vector.shape_cast %54 : vector<1x32xf32> to vector<1x32xf32>
    %56 = vector.broadcast %55 : vector<1x32xf32> to vector<4x32xf32>
    %cst_40 = arith.constant 5.000000e-01 : f32
    %57 = vector.broadcast %cst_40 : f32 to vector<4x32xf32>
    %58 = arith.cmpf ogt, %56, %57 : vector<4x32xf32>
    %cst_41 = arith.constant 0.000000e+00 : f32
    %59 = vector.broadcast %cst_41 : f32 to vector<4x32xf32>
    %60 = arith.select %58, %53, %59 : vector<4x32xi1>, vector<4x32xf32>
    %c8 = arith.constant 8 : index
    %c0_42 = arith.constant 0 : index
    %61 = vector.load %arg14[%c8, %c0_42] : memref<24x32xf32, #tpu.memory_space<vmem>>, vector<4x32xf32>
    tpu.vector_store %arg14[%c8, %c0_42], %60 {strides = array<i32>} : memref<24x32xf32, #tpu.memory_space<vmem>>, vector<4x32xf32>,
    %c0_43 = arith.constant 0 : index
    %c2 = arith.constant 2 : index
    %62 = vector.load %arg13[%c0_43, %c2] : memref<4x35xf32, #tpu.memory_space<vmem>>, vector<4x32xf32>
    %c2_44 = arith.constant 2 : index
    %c0_45 = arith.constant 0 : index
    %63 = vector.load %arg5[%c2_44, %c0_45] : memref<3x32xf32, #tpu.memory_space<vmem>>, vector<1x32xf32>
    %64 = vector.shape_cast %63 : vector<1x32xf32> to vector<1x32xf32>
    %65 = vector.broadcast %64 : vector<1x32xf32> to vector<4x32xf32>
    %cst_46 = arith.constant 5.000000e-01 : f32
    %66 = vector.broadcast %cst_46 : f32 to vector<4x32xf32>
    %67 = arith.cmpf ogt, %65, %66 : vector<4x32xf32>
    %cst_47 = arith.constant 0.000000e+00 : f32
    %68 = vector.broadcast %cst_47 : f32 to vector<4x32xf32>
    %69 = arith.select %67, %62, %68 : vector<4x32xi1>, vector<4x32xf32>
    %c16 = arith.constant 16 : index
    %c0_48 = arith.constant 0 : index
    %70 = vector.load %arg14[%c16, %c0_48] : memref<24x32xf32, #tpu.memory_space<vmem>>, vector<4x32xf32>
    tpu.vector_store %arg14[%c16, %c0_48], %69 {strides = array<i32>} : memref<24x32xf32, #tpu.memory_space<vmem>>, vector<4x32xf32>,
    %c0_49 = arith.constant 0 : index
    %c0_50 = arith.constant 0 : index
    %71 = vector.load %arg8[%c0_49, %c0_50] : memref<4x24xf32, #tpu.memory_space<vmem>>, vector<4x24xf32>
    %c0_51 = arith.constant 0 : index
    %c0_52 = arith.constant 0 : index
    %72 = vector.load %arg14[%c0_51, %c0_52] : memref<24x32xf32, #tpu.memory_space<vmem>>, vector<24x32xf32>
    %cst_53 = arith.constant dense<0.000000e+00> : vector<4x32xf32>
    %73 = tpu.matmul %71, %72, %cst_53 {dimension_numbers = #tpu.dot_dimension_numbers<[1], [0], [0], [1], [0, 0, 1, 1], [], []>} : vector<4x24xf32>, vector<24x32xf32>, vector<4x32xf32> -> vector<4x32xf32>
    %74 = vector.broadcast %11 : vector<4x1xf32> to vector<4x32xf32>
    %75 = arith.addf %73, %74 : vector<4x32xf32>
    %c0_54 = arith.constant 0 : index
    %c0_55 = arith.constant 0 : index
    %76 = vector.load %arg2[%c0_54, %c0_55] : memref<32x2xf32, #tpu.memory_space<vmem>>, vector<32x2xf32>
    %cst_56 = arith.constant dense<0.000000e+00> : vector<4x2xf32>
    %77 = tpu.matmul %75, %76, %cst_56 {dimension_numbers = #tpu.dot_dimension_numbers<[1], [0], [0], [1], [0, 0, 1, 1], [], []>} : vector<4x32xf32>, vector<32x2xf32>, vector<4x2xf32> -> vector<4x2xf32>
    %cst_57 = arith.constant 6.250000e-02 : f32
    %78 = vector.broadcast %cst_57 : f32 to vector<4x2xf32>
    %79 = arith.mulf %77, %78 : vector<4x2xf32>
    %c0_58 = arith.constant 0 : index
    %c0_59 = arith.constant 0 : index
    %80 = vector.load %arg3[%c0_58, %c0_59] : memref<2x32xf32, #tpu.memory_space<vmem>>, vector<2x32xf32>
    %cst_60 = arith.constant dense<0.000000e+00> : vector<4x32xf32>
    %81 = tpu.matmul %79, %80, %cst_60 {dimension_numbers = #tpu.dot_dimension_numbers<[1], [0], [0], [1], [0, 0, 1, 1], [], []>} : vector<4x2xf32>, vector<2x32xf32>, vector<4x32xf32> -> vector<4x32xf32>
    %82 = arith.subf %75, %81 : vector<4x32xf32>
    %83 = arith.mulf %82, %82 : vector<4x32xf32>
    %c0_61 = arith.constant 0 : index
    %c0_62 = arith.constant 0 : index
    %84 = vector.load %arg2[%c0_61, %c0_62] : memref<32x2xf32, #tpu.memory_space<vmem>>, vector<32x2xf32>
    %cst_63 = arith.constant dense<0.000000e+00> : vector<4x2xf32>
    %85 = tpu.matmul %83, %84, %cst_63 {dimension_numbers = #tpu.dot_dimension_numbers<[1], [0], [0], [1], [0, 0, 1, 1], [], []>} : vector<4x32xf32>, vector<32x2xf32>, vector<4x2xf32> -> vector<4x2xf32>
    %cst_64 = arith.constant 6.250000e-02 : f32
    %86 = vector.broadcast %cst_64 : f32 to vector<4x2xf32>
    %87 = arith.mulf %85, %86 : vector<4x2xf32>
    %c0_65 = arith.constant 0 : index
    %c0_66 = arith.constant 0 : index
    %88 = vector.load %arg3[%c0_65, %c0_66] : memref<2x32xf32, #tpu.memory_space<vmem>>, vector<2x32xf32>
    %cst_67 = arith.constant dense<0.000000e+00> : vector<4x32xf32>
    %89 = tpu.matmul %87, %88, %cst_67 {dimension_numbers = #tpu.dot_dimension_numbers<[1], [0], [0], [1], [0, 0, 1, 1], [], []>} : vector<4x2xf32>, vector<2x32xf32>, vector<4x32xf32> -> vector<4x32xf32>
    %cst_68 = arith.constant 9.99999974E-6 : f32
    %90 = vector.broadcast %cst_68 : f32 to vector<4x32xf32>
    %91 = arith.addf %89, %90 : vector<4x32xf32>
    %92 = math.rsqrt %91 : vector<4x32xf32>
    %93 = arith.mulf %82, %92 : vector<4x32xf32>
    %94 = vector.broadcast %9 : vector<4x1xf32> to vector<4x32xf32>
    %95 = arith.mulf %93, %94 : vector<4x32xf32>
    %96 = vector.broadcast %10 : vector<4x1xf32> to vector<4x32xf32>
    %97 = arith.addf %95, %96 : vector<4x32xf32>
    %cst_69 = arith.constant 0.000000e+00 : f32
    %98 = vector.broadcast %cst_69 : f32 to vector<4x32xf32>
    %99 = arith.subf %98, %97 : vector<4x32xf32>
    %100 = math.exp %99 : vector<4x32xf32>
    %cst_70 = arith.constant 1.000000e+00 : f32
    %101 = vector.broadcast %cst_70 : f32 to vector<4x32xf32>
    %102 = arith.addf %101, %100 : vector<4x32xf32>
    %cst_71 = arith.constant 1.000000e+00 : f32
    %103 = vector.broadcast %cst_71 : f32 to vector<4x32xf32>
    %104 = arith.divf %103, %102 : vector<4x32xf32>
    %105 = arith.mulf %97, %104 : vector<4x32xf32>
    %c0_72 = arith.constant 0 : index
    %c1_73 = arith.constant 1 : index
    %106 = vector.load %arg13[%c0_72, %c1_73] : memref<4x35xf32, #tpu.memory_space<vmem>>, vector<4x32xf32>
    tpu.vector_store %arg13[%c0_72, %c1_73], %105 {strides = array<i32>} : memref<4x35xf32, #tpu.memory_space<vmem>>, vector<4x32xf32>,
    %c0_74 = arith.constant 0 : index
    %c0_75 = arith.constant 0 : index
    %107 = vector.load %arg13[%c0_74, %c0_75] : memref<4x35xf32, #tpu.memory_space<vmem>>, vector<4x32xf32>
    %c0_76 = arith.constant 0 : index
    %c0_77 = arith.constant 0 : index
    %108 = vector.load %arg5[%c0_76, %c0_77] : memref<3x32xf32, #tpu.memory_space<vmem>>, vector<1x32xf32>
    %109 = vector.shape_cast %108 : vector<1x32xf32> to vector<1x32xf32>
    %110 = vector.broadcast %109 : vector<1x32xf32> to vector<4x32xf32>
    %cst_78 = arith.constant 5.000000e-01 : f32
    %111 = vector.broadcast %cst_78 : f32 to vector<4x32xf32>
    %112 = arith.cmpf ogt, %110, %111 : vector<4x32xf32>
    %cst_79 = arith.constant 0.000000e+00 : f32
    %113 = vector.broadcast %cst_79 : f32 to vector<4x32xf32>
    %114 = arith.select %112, %107, %113 : vector<4x32xi1>, vector<4x32xf32>
    %c0_80 = arith.constant 0 : index
    %c0_81 = arith.constant 0 : index
    %115 = vector.load %arg14[%c0_80, %c0_81] : memref<24x32xf32, #tpu.memory_space<vmem>>, vector<4x32xf32>
    tpu.vector_store %arg14[%c0_80, %c0_81], %114 {strides = array<i32>} : memref<24x32xf32, #tpu.memory_space<vmem>>, vector<4x32xf32>,
    %c0_82 = arith.constant 0 : index
    %c1_83 = arith.constant 1 : index
    %116 = vector.load %arg13[%c0_82, %c1_83] : memref<4x35xf32, #tpu.memory_space<vmem>>, vector<4x32xf32>
    %c1_84 = arith.constant 1 : index
    %c0_85 = arith.constant 0 : index
    %117 = vector.load %arg5[%c1_84, %c0_85] : memref<3x32xf32, #tpu.memory_space<vmem>>, vector<1x32xf32>
    %118 = vector.shape_cast %117 : vector<1x32xf32> to vector<1x32xf32>
    %119 = vector.broadcast %118 : vector<1x32xf32> to vector<4x32xf32>
    %cst_86 = arith.constant 5.000000e-01 : f32
    %120 = vector.broadcast %cst_86 : f32 to vector<4x32xf32>
    %121 = arith.cmpf ogt, %119, %120 : vector<4x32xf32>
    %cst_87 = arith.constant 0.000000e+00 : f32
    %122 = vector.broadcast %cst_87 : f32 to vector<4x32xf32>
    %123 = arith.select %121, %116, %122 : vector<4x32xi1>, vector<4x32xf32>
    %c8_88 = arith.constant 8 : index
    %c0_89 = arith.constant 0 : index
    %124 = vector.load %arg14[%c8_88, %c0_89] : memref<24x32xf32, #tpu.memory_space<vmem>>, vector<4x32xf32>
    tpu.vector_store %arg14[%c8_88, %c0_89], %123 {strides = array<i32>} : memref<24x32xf32, #tpu.memory_space<vmem>>, vector<4x32xf32>,
    %c0_90 = arith.constant 0 : index
    %c2_91 = arith.constant 2 : index
    %125 = vector.load %arg13[%c0_90, %c2_91] : memref<4x35xf32, #tpu.memory_space<vmem>>, vector<4x32xf32>
    %c2_92 = arith.constant 2 : index
    %c0_93 = arith.constant 0 : index
    %126 = vector.load %arg5[%c2_92, %c0_93] : memref<3x32xf32, #tpu.memory_space<vmem>>, vector<1x32xf32>
    %127 = vector.shape_cast %126 : vector<1x32xf32> to vector<1x32xf32>
    %128 = vector.broadcast %127 : vector<1x32xf32> to vector<4x32xf32>
    %cst_94 = arith.constant 5.000000e-01 : f32
    %129 = vector.broadcast %cst_94 : f32 to vector<4x32xf32>
    %130 = arith.cmpf ogt, %128, %129 : vector<4x32xf32>
    %cst_95 = arith.constant 0.000000e+00 : f32
    %131 = vector.broadcast %cst_95 : f32 to vector<4x32xf32>
    %132 = arith.select %130, %125, %131 : vector<4x32xi1>, vector<4x32xf32>
    %c16_96 = arith.constant 16 : index
    %c0_97 = arith.constant 0 : index
    %133 = vector.load %arg14[%c16_96, %c0_97] : memref<24x32xf32, #tpu.memory_space<vmem>>, vector<4x32xf32>
    tpu.vector_store %arg14[%c16_96, %c0_97], %132 {strides = array<i32>} : memref<24x32xf32, #tpu.memory_space<vmem>>, vector<4x32xf32>,
    %c0_98 = arith.constant 0 : index
    %c0_99 = arith.constant 0 : index
    %134 = vector.load %arg9[%c0_98, %c0_99] : memref<4x24xf32, #tpu.memory_space<vmem>>, vector<4x24xf32>
    %c0_100 = arith.constant 0 : index
    %c0_101 = arith.constant 0 : index
    %135 = vector.load %arg14[%c0_100, %c0_101] : memref<24x32xf32, #tpu.memory_space<vmem>>, vector<24x32xf32>
    %cst_102 = arith.constant dense<0.000000e+00> : vector<4x32xf32>
    %136 = tpu.matmul %134, %135, %cst_102 {dimension_numbers = #tpu.dot_dimension_numbers<[1], [0], [0], [1], [0, 0, 1, 1], [], []>} : vector<4x24xf32>, vector<24x32xf32>, vector<4x32xf32> -> vector<4x32xf32>
    %137 = vector.broadcast %12 : vector<4x1xf32> to vector<4x32xf32>
    %138 = arith.addf %136, %137 : vector<4x32xf32>
    %139 = arith.addf %138, %5 : vector<4x32xf32>
    %c0_103 = arith.constant 0 : index
    %c0_104 = arith.constant 0 : index
    %140 = vector.load %arg11[%c0_103, %c0_104] : memref<8x1xf32, #tpu.memory_space<vmem>>, vector<8x1xf32>
    %c0_105 = arith.constant 0 : index
    %c1_106 = arith.constant 1 : index
    %141 = vector.load %arg13[%c0_105, %c1_106] : memref<4x35xf32, #tpu.memory_space<vmem>>, vector<4x32xf32>
    tpu.vector_store %arg13[%c0_105, %c1_106], %139 {strides = array<i32>} : memref<4x35xf32, #tpu.memory_space<vmem>>, vector<4x32xf32>,
    %c0_107 = arith.constant 0 : index
    %c0_108 = arith.constant 0 : index
    %142 = vector.load %arg13[%c0_107, %c0_108] : memref<4x35xf32, #tpu.memory_space<vmem>>, vector<4x32xf32>
    %c0_109 = arith.constant 0 : index
    %c0_110 = arith.constant 0 : index
    %143 = vector.load %arg6[%c0_109, %c0_110] : memref<4x32xf32, #tpu.memory_space<vmem>>, vector<1x32xf32>
    %144 = vector.shape_cast %143 : vector<1x32xf32> to vector<1x32xf32>
    %145 = vector.broadcast %144 : vector<1x32xf32> to vector<4x32xf32>
    %cst_111 = arith.constant 5.000000e-01 : f32
    %146 = vector.broadcast %cst_111 : f32 to vector<4x32xf32>
    %147 = arith.cmpf ogt, %145, %146 : vector<4x32xf32>
    %cst_112 = arith.constant 0.000000e+00 : f32
    %148 = vector.broadcast %cst_112 : f32 to vector<4x32xf32>
    %149 = arith.select %147, %142, %148 : vector<4x32xi1>, vector<4x32xf32>
    %c0_113 = arith.constant 0 : index
    %c0_114 = arith.constant 0 : index
    %150 = vector.load %arg15[%c0_113, %c0_114] : memref<32x32xf32, #tpu.memory_space<vmem>>, vector<4x32xf32>
    tpu.vector_store %arg15[%c0_113, %c0_114], %149 {strides = array<i32>} : memref<32x32xf32, #tpu.memory_space<vmem>>, vector<4x32xf32>,
    %c0_115 = arith.constant 0 : index
    %c1_116 = arith.constant 1 : index
    %151 = vector.load %arg13[%c0_115, %c1_116] : memref<4x35xf32, #tpu.memory_space<vmem>>, vector<4x32xf32>
    %c1_117 = arith.constant 1 : index
    %c0_118 = arith.constant 0 : index
    %152 = vector.load %arg6[%c1_117, %c0_118] : memref<4x32xf32, #tpu.memory_space<vmem>>, vector<1x32xf32>
    %153 = vector.shape_cast %152 : vector<1x32xf32> to vector<1x32xf32>
    %154 = vector.broadcast %153 : vector<1x32xf32> to vector<4x32xf32>
    %cst_119 = arith.constant 5.000000e-01 : f32
    %155 = vector.broadcast %cst_119 : f32 to vector<4x32xf32>
    %156 = arith.cmpf ogt, %154, %155 : vector<4x32xf32>
    %cst_120 = arith.constant 0.000000e+00 : f32
    %157 = vector.broadcast %cst_120 : f32 to vector<4x32xf32>
    %158 = arith.select %156, %151, %157 : vector<4x32xi1>, vector<4x32xf32>
    %c8_121 = arith.constant 8 : index
    %c0_122 = arith.constant 0 : index
    %159 = vector.load %arg15[%c8_121, %c0_122] : memref<32x32xf32, #tpu.memory_space<vmem>>, vector<4x32xf32>
    tpu.vector_store %arg15[%c8_121, %c0_122], %158 {strides = array<i32>} : memref<32x32xf32, #tpu.memory_space<vmem>>, vector<4x32xf32>,
    %c0_123 = arith.constant 0 : index
    %c2_124 = arith.constant 2 : index
    %160 = vector.load %arg13[%c0_123, %c2_124] : memref<4x35xf32, #tpu.memory_space<vmem>>, vector<4x32xf32>
    %c2_125 = arith.constant 2 : index
    %c0_126 = arith.constant 0 : index
    %161 = vector.load %arg6[%c2_125, %c0_126] : memref<4x32xf32, #tpu.memory_space<vmem>>, vector<1x32xf32>
    %162 = vector.shape_cast %161 : vector<1x32xf32> to vector<1x32xf32>
    %163 = vector.broadcast %162 : vector<1x32xf32> to vector<4x32xf32>
    %cst_127 = arith.constant 5.000000e-01 : f32
    %164 = vector.broadcast %cst_127 : f32 to vector<4x32xf32>
    %165 = arith.cmpf ogt, %163, %164 : vector<4x32xf32>
    %cst_128 = arith.constant 0.000000e+00 : f32
    %166 = vector.broadcast %cst_128 : f32 to vector<4x32xf32>
    %167 = arith.select %165, %160, %166 : vector<4x32xi1>, vector<4x32xf32>
    %c16_129 = arith.constant 16 : index
    %c0_130 = arith.constant 0 : index
    %168 = vector.load %arg15[%c16_129, %c0_130] : memref<32x32xf32, #tpu.memory_space<vmem>>, vector<4x32xf32>
    tpu.vector_store %arg15[%c16_129, %c0_130], %167 {strides = array<i32>} : memref<32x32xf32, #tpu.memory_space<vmem>>, vector<4x32xf32>,
    %c0_131 = arith.constant 0 : index
    %c3 = arith.constant 3 : index
    %169 = vector.load %arg13[%c0_131, %c3] : memref<4x35xf32, #tpu.memory_space<vmem>>, vector<4x32xf32>
    %c3_132 = arith.constant 3 : index
    %c0_133 = arith.constant 0 : index
    %170 = vector.load %arg6[%c3_132, %c0_133] : memref<4x32xf32, #tpu.memory_space<vmem>>, vector<1x32xf32>
    %171 = vector.shape_cast %170 : vector<1x32xf32> to vector<1x32xf32>
    %172 = vector.broadcast %171 : vector<1x32xf32> to vector<4x32xf32>
    %cst_134 = arith.constant 5.000000e-01 : f32
    %173 = vector.broadcast %cst_134 : f32 to vector<4x32xf32>
    %174 = arith.cmpf ogt, %172, %173 : vector<4x32xf32>
    %cst_135 = arith.constant 0.000000e+00 : f32
    %175 = vector.broadcast %cst_135 : f32 to vector<4x32xf32>
    %176 = arith.select %174, %169, %175 : vector<4x32xi1>, vector<4x32xf32>
    %c24 = arith.constant 24 : index
    %c0_136 = arith.constant 0 : index
    %177 = vector.load %arg15[%c24, %c0_136] : memref<32x32xf32, #tpu.memory_space<vmem>>, vector<4x32xf32>
    tpu.vector_store %arg15[%c24, %c0_136], %176 {strides = array<i32>} : memref<32x32xf32, #tpu.memory_space<vmem>>, vector<4x32xf32>,
    %c0_137 = arith.constant 0 : index
    %c0_138 = arith.constant 0 : index
    %178 = vector.load %arg10[%c0_137, %c0_138] : memref<8x32xf32, #tpu.memory_space<vmem>>, vector<8x32xf32>
    %c0_139 = arith.constant 0 : index
    %c0_140 = arith.constant 0 : index
    %179 = vector.load %arg15[%c0_139, %c0_140] : memref<32x32xf32, #tpu.memory_space<vmem>>, vector<32x32xf32>
    %cst_141 = arith.constant dense<0.000000e+00> : vector<8x32xf32>
    %180 = tpu.matmul %178, %179, %cst_141 {dimension_numbers = #tpu.dot_dimension_numbers<[1], [0], [0], [1], [0, 0, 1, 1], [], []>} : vector<8x32xf32>, vector<32x32xf32>, vector<8x32xf32> -> vector<8x32xf32>
    %181 = vector.broadcast %140 : vector<8x1xf32> to vector<8x32xf32>
    %182 = arith.addf %180, %181 : vector<8x32xf32>
    %c0_142 = arith.constant 0 : index
    %c0_143 = arith.constant 0 : index
    %c0_144 = arith.constant 0 : index
    %183 = vector.load %arg12[%c0_142, %c0_143, %c0_144] : memref<1x8x32xf32, #tpu.memory_space<vmem>>, vector<1x8x32xf32>
    %184 = vector.shape_cast %183 : vector<1x8x32xf32> to vector<8x32xf32>
    %185 = vector.shape_cast %182 : vector<8x32xf32> to vector<1x8x32xf32>
    tpu.vector_store %arg12[%c0_142, %c0_143, %c0_144], %185 {strides = array<i32>} : memref<1x8x32xf32, #tpu.memory_space<vmem>>, vector<1x8x32xf32>,
    return
  }
  func.func @transform_0(%arg0: i32) -> (i32, i32, i32) {
    %c0_i32 = arith.constant 0 : i32
    %c0_i32_0 = arith.constant 0 : i32
    %c0_i32_1 = arith.constant 0 : i32
    return %arg0, %c0_i32, %c0_i32_0 : i32, i32, i32
  }
  func.func @transform_1(%arg0: i32) -> (i32, i32) {
    %c0_i32 = arith.constant 0 : i32
    %c0_i32_0 = arith.constant 0 : i32
    %c0_i32_1 = arith.constant 0 : i32
    return %c0_i32, %c0_i32_0 : i32, i32
  }
  func.func @transform_2(%arg0: i32) -> (i32, i32) {
    %c0_i32 = arith.constant 0 : i32
    %c0_i32_0 = arith.constant 0 : i32
    %c0_i32_1 = arith.constant 0 : i32
    return %c0_i32, %c0_i32_0 : i32, i32
  }
  func.func @transform_3(%arg0: i32) -> (i32, i32) {
    %c0_i32 = arith.constant 0 : i32
    %c0_i32_0 = arith.constant 0 : i32
    %c0_i32_1 = arith.constant 0 : i32
    return %c0_i32, %c0_i32_0 : i32, i32
  }
  func.func @transform_4(%arg0: i32) -> (i32, i32) {
    %c0_i32 = arith.constant 0 : i32
    %c0_i32_0 = arith.constant 0 : i32
    %c0_i32_1 = arith.constant 0 : i32
    return %c0_i32, %c0_i32_0 : i32, i32
  }
  func.func @transform_5(%arg0: i32) -> (i32, i32) {
    %c0_i32 = arith.constant 0 : i32
    %c0_i32_0 = arith.constant 0 : i32
    %c0_i32_1 = arith.constant 0 : i32
    return %c0_i32, %c0_i32_0 : i32, i32
  }
  func.func @transform_6(%arg0: i32) -> (i32, i32) {
    %c0_i32 = arith.constant 0 : i32
    %c0_i32_0 = arith.constant 0 : i32
    %c0_i32_1 = arith.constant 0 : i32
    return %c0_i32, %c0_i32_0 : i32, i32
  }
  func.func @transform_7(%arg0: i32) -> (i32, i32) {
    %c0_i32 = arith.constant 0 : i32
    %c0_i32_0 = arith.constant 0 : i32
    %c0_i32_1 = arith.constant 0 : i32
    return %c0_i32, %c0_i32_0 : i32, i32
  }
  func.func @transform_8(%arg0: i32) -> (i32, i32) {
    %c0_i32 = arith.constant 0 : i32
    %c0_i32_0 = arith.constant 0 : i32
    %c0_i32_1 = arith.constant 0 : i32
    return %c0_i32, %c0_i32_0 : i32, i32
  }
  func.func @transform_9(%arg0: i32) -> (i32, i32) {
    %c0_i32 = arith.constant 0 : i32
    %c0_i32_0 = arith.constant 0 : i32
    %c0_i32_1 = arith.constant 0 : i32
    return %c0_i32, %c0_i32_0 : i32, i32
  }
  func.func @transform_10(%arg0: i32) -> (i32, i32) {
    %c0_i32 = arith.constant 0 : i32
    %c0_i32_0 = arith.constant 0 : i32
    %c0_i32_1 = arith.constant 0 : i32
    return %c0_i32, %c0_i32_0 : i32, i32
  }
  func.func @transform_11(%arg0: i32) -> (i32, i32, i32) {
    %c0_i32 = arith.constant 0 : i32
    %c0_i32_0 = arith.constant 0 : i32
    %c0_i32_1 = arith.constant 0 : i32
    return %arg0, %c0_i32, %c0_i32_0 : i32, i32, i32
  }
}

</mosaic_0001>

<bundles_post_ra>
// kernel: tpu_custom_call.1
= control target key start
LH: loop header
LB: loop body
LE: loop exit
PB: predicated region body
PF: predicated region fallthrough
CT: control target
= control target key end

     0   :  { %vm39_vm0 = vcmask 261120   ;;  %v1309_v1 = vmov 0.0   ;;  %vm1310_vm1 = vmmov 0   ;;  %s1604_s0 = inlined_call_operand.vmem [shape: f32[1,4,32], index: 0, kind: input, shape index: {}]   ;;  %s1605_s1 = inlined_call_operand.vmem [shape: f32[32,2], index: 1, kind: input, shape index: {}]   ;;  %s1606_s2 = inlined_call_operand.vmem [shape: f32[2,32], index: 2, kind: input, shape index: {}]   ;;  %s1607_s3 = inlined_call_operand.vmem [shape: f32[4,4], index: 3, kind: input, shape index: {}]   ;;  %s1608_s4 = inlined_call_operand.vmem [shape: f32[3,32], index: 4, kind: input, shape index: {}]   ;;  %s1609_s5 = inlined_call_operand.vmem [shape: f32[4,32], index: 5, kind: input, shape index: {}]   ;;  %s1610_s6 = inlined_call_operand.vmem [shape: f32[4,8], index: 6, kind: input, shape index: {}]   ;;  %s1611_s7 = inlined_call_operand.vmem [shape: f32[4,24], index: 7, kind: input, shape index: {}]   ;;  %s1612_s8 = inlined_call_operand.vmem [shape: f32[4,24], index: 8, kind: input, shape index: {}]   ;;  %s1613_s9 = inlined_call_operand.vmem [shape: f32[8,32], index: 9, kind: input, shape index: {}]   ;;  %s1614_s10 = inlined_call_operand.vmem [shape: f32[8,1], index: 10, kind: input, shape index: {}]   ;;  %s1615_s11 = inlined_call_operand.hbm [shape: f32[1,8,32], index: 11, kind: output, shape index: {}]  }
   0x1   :  { %v1385_v0 = vld [vmem:[%s1605_s1 + $0x18] sm:$0xff]  ;;  %1162 = vmatprep.subr.mxu0 %v1309_v1  ;;  %v1391_v2 = vld [vmem:[%s1605_s1 + $0x10] sm:$0xff]  ;;  %1170 = vmatprep.mubr.msk.f32.mxu0 %vm1310_vm1, %v1309_v1  ;;  %40 = vst.msk [vmem:[#allocation3] sm:$0xff] %vm39_vm0, %v1309_v1  ;;  %41 = vst.msk [vmem:[#allocation3 + $0x8] sm:$0xff] %vm39_vm0, %v1309_v1 }
   0x2   :  { %42 = vst.msk [vmem:[#allocation3 + $0x10] sm:$0xff] %vm39_vm0, %v1309_v1  ;;  %43 = vst.msk [vmem:[#allocation4] sm:$0xff] %vm39_vm0, %v1309_v1 }
   0x3   :  { %44 = vst.msk [vmem:[#allocation4 + $0x8] sm:$0xff] %vm39_vm0, %v1309_v1  ;;  %45 = vst.msk [vmem:[#allocation4 + $0x10] sm:$0xff] %vm39_vm0, %v1309_v1 }
   0x4   :  { %46 = vst.msk [vmem:[#allocation4 + $0x18] sm:$0xff] %vm39_vm0, %v1309_v1 }
   0x5   :  { %16 = vsyncpa [#allocation6], 0  ;;  %1163 = vmatpush3.msra.mxu0 %v1385_v0  ;;  %1173 = vmatprep.subr.mxu1 %v1309_v1  ;;  %v1415_v3 = vld [vmem:[%s1605_s1 + $0x8] sm:$0xff]  ;;  %v1424_v4 = vld [vmem:[%s1605_s1] sm:$0xff]  ;;  %vm132_vm2 = vcmask 1041408   ;;  %vm128_vm3 = vcmask 15360  }
   0x6   :  { %1164 = vmatprep.subr.mxu0 %v1309_v1  ;;  %1175 = vmatprep.mubr.msk.f32.mxu1 %vm1310_vm1, %v1309_v1  ;;  %v1430_v5 = vld [vmem:[%s1604_s0] sm:$0xf]  ;;  %v1311_v15 = vmov 0   ;;  %v1312_v16 = vmov 1   ;;  %vm379_vm4 = vcmask 265224   ;;  %vm389_vm6 = vcmask 257024  }
   0x7   :  { %1165 = vmatpush3.msra.mxu0 %v1391_v2  ;;  %v127_v6 = vld [vmem:[%s1606_s2] sm:$0x3]  ;;  %1268 = vset.pattern.permute.xlu0 %v1311_v15  ;;  %s1314_s30 = smov 126   ;;  %s1315_s12 = smov 127   ;;  %v1316_v41 = vmov 4   ;;  %vm425_vm9 = vcmask 195584  }
   0x8   :  { %1166 = vmatprep.subr.mxu0 %v1309_v1  ;;  %1174 = vmatpush3.msk.msra.mxu1 %vm132_vm2, %v127_v6  ;;  %v1472_v14 = vld [vmem:[%s1610_s6] sm:$0xf]  ;;  %s1313_s6 = smov 1   ;;  %s1321_s27 = smov [#allocation5]  }
   0x9   :  { %1167 = vmatpush3.msra.mxu0 %v1415_v3  ;;  %1178 = vmatprep.subr.mxu1 %v1309_v1  ;;  %v1484_v36 = vld [vmem:[%s1608_s4] ss:$0 sm:$0xff]  ;;  %v1496_v42 = vld [vmem:[%s1608_s4 + $0x2] ss:$0 sm:$0xff]  ;;  %v1502_v43 = vld [vmem:[%s1608_s4 + $0x1] ss:$0 sm:$0xff] }
   0xa   :  { %1168 = vmatprep.subr.mxu0 %v1309_v1  ;;  %359 = vperm.xlu0 %1268, %v1472_v14   ;;  %vm387_vm5 = vcmp.gt.f32.partialorder %v1484_v36, 0.5  ;;  %vm410_vm7 = vcmp.gt.f32.partialorder %v1496_v42, 0.5  ;;  %vm397_vm8 = vcmp.gt.f32.partialorder %v1502_v43, 0.5  ;;  %v417_v50 = vld [vmem:[%s1611_s7] sm:$0xf] }
   0xb   :  { %1169 = vmatpush3.msra.mxu0 %v1424_v4  ;;  %v577_v52 = vld [vmem:[%s1606_s2] sm:$0x3] }
   0xc   :  { %1171 = vmatmul.mubr.msk.f32.vlgmr.msra.gmra.mxu0 %vm39_vm0, %v1430_v5  ;;  %1203 = vmatprep.subr.mxu0 %v1309_v1  ;;  %v1116_v42 = vld [vmem:[%s1609_s5] ss:$0 sm:$0xff] }
   0xd   :  { %1204 = vmatpush3.msra.mxu0 %v1385_v0  ;;  %1211 = vmatprep.mubr.msk.f32.mxu0 %vm1310_vm1, %v1309_v1  ;;  %vm956_vm10 = vcmp.gt.f32.partialorder %v1116_v42, 0.5 }
   0xe   :  { %1205 = vmatprep.subr.mxu0 %v1309_v1  ;;  %1269 = vset.pattern.permute.xlu0 %v1312_v16 }
   0xf   :  { %1206 = vmatpush3.msra.mxu0 %v1391_v2  ;;  %364 = vperm.xlu0 %1269, %v1472_v14  }
  0x10   :  { %1207 = vmatprep.subr.mxu0 %v1309_v1 }
  0x11   :  { %1208 = vmatpush3.msra.mxu0 %v1415_v3 }
  0x12   :  { %1209 = vmatprep.subr.mxu0 %v1309_v1 }
  0x13   :  { %1210 = vmatpush3.msra.mxu0 %v1424_v4  ;;  %1270 = vset.pattern.permute.xlu0 %v1316_v41 }
  0x14   :  { %1219 = vmatprep.subr.mxu0 %v1309_v1  ;;  %422 = vperm.xlu0 %1270, %v1472_v14  }
  0x18   :  { %1274 = vset.pattern.permute.xlu0 %v1311_v15 }
  0x85   :  { %v360_v23 = vpop.permute.xlu0 %359 }
  0x8a   :  { %v365_v26 = vpop.permute.xlu0 %364 }
  0x8f   :  { %v423_v53 = vpop.permute.xlu0 %422 }
  0xcc   :  { %v122_v7 = vpop.f32.mrf.mxu0 }
  0xcd   :  { %v126_v8 = vmul.f32 0.0625, %v122_v7 }
  0xce   :  { %v1172_v9 = vpop.f32.mrf.mxu0 }
  0xcf   :  { %1176 = vmatmul.mubr.msk.f32.vlgmr.msra.gmra.mxu1 %vm128_vm3, %v126_v8 }
  0xd0   :  { %1179 = vmatpush3.msra.mxu1 %v1385_v0  ;;  %1186 = vmatprep.mubr.msk.f32.mxu1 %vm1310_vm1, %v1309_v1 }
  0xd1   :  { %1180 = vmatprep.subr.mxu1 %v1309_v1 }
  0xd2   :  { %1181 = vmatpush3.msra.mxu1 %v1391_v2 }
  0xd3   :  { %1182 = vmatprep.subr.mxu1 %v1309_v1 }
  0xd4   :  { %1183 = vmatpush3.msra.mxu1 %v1415_v3 }
  0xd5   :  { %1184 = vmatprep.subr.mxu1 %v1309_v1 }
  0xd6   :  { %1185 = vmatpush3.msra.mxu1 %v1424_v4 }
  0xd7   :  { %1189 = vmatprep.subr.mxu1 %v1309_v1 }
 0x18f   :  { %v202_v10 = vpop.f32.mrf.mxu1 }
 0x190   :  { %v206_v11 = vsub.f32 %v1430_v5, %v202_v10 }
 0x191   :  { %v1177_v12 = vpop.f32.mrf.mxu1 }
 0x192   :  { %v207_v13 = vmul.f32 %v206_v11, %v206_v11 }
 0x194   :  { %1187 = vmatmul.mubr.msk.f32.vlgmr.msra.gmra.mxu1 %vm39_vm0, %v207_v13 }
 0x195   :  { %1190 = vmatpush3.msk.msra.mxu1 %vm132_vm2, %v127_v6  ;;  %1191 = vmatprep.mubr.msk.f32.mxu1 %vm1310_vm1, %v1309_v1 }
 0x196   :  { %1194 = vmatprep.subr.mxu1 %v1309_v1 }
 0x254   :  { %v277_v17 = vpop.f32.mrf.mxu1 }
 0x255   :  { %v281_v18 = vmul.f32 0.0625, %v277_v17 }
 0x256   :  { %v1188_v19 = vpop.f32.mrf.mxu1 }
 0x257   :  { %1192 = vmatmul.mubr.msk.f32.vlgmr.msra.gmra.mxu1 %vm128_vm3, %v281_v18 }
 0x258   :  { %1200 = vmatprep.mubr.msk.f32.mxu1 %vm1310_vm1, %v1309_v1 }
 0x317   :  { %v351_v20 = vpop.f32.mrf.mxu1 }
 0x318   :  { %v352_v21 = vadd.f32 1e-05, %v351_v20 }
 0x319   :  { %v1193_v22 = vpop.f32.mrf.mxu1 }
 0x31a   :  { %1275 = vrsqrt.f32 %v352_v21 }
 0x327   :  { %v1276_v24 = vpop.eup %1275 }
 0x328   :  { %v356_v25 = vmul.f32 %v1276_v24, %v206_v11 }
 0x32a   :  { %v362_v27 = vmul.f32 %v360_v23, %v356_v25 }
 0x32c   :  { %v367_v28 = vadd.f32 %v365_v26, %v362_v27 }
 0x32e   :  { %v368_v29 = vsub.f32 0.0, %v367_v28 }
 0x330   :  { %v369_v30 = vmul.f32 1.442695, %v368_v29 }
 0x332   :  { %1277 = vpow2.f32 %v369_v30 }
 0x33f   :  { %v1278_v31 = vpop.eup %1277 }
 0x340   :  { %v371_v32 = vadd.f32 1.0, %v1278_v31 }
 0x342   :  { %1279 = vrcp.f32 %v371_v32 }
 0x34f   :  { %v1280_v33 = vpop.eup %1279 }
 0x350   :  { %v374_v34 = vmul.f32 %v1280_v33, %v367_v28  ;;  %v1319_v28 = vmov 5  }
 0x352   :  { %376 = vrot.lane.b32.xlu1 %v374_v34, %s1313_s6 }
 0x3c4   :  { %v377_v35 = vpop.permute.xlu1 %376 }
 0x3c5   :  { %380 = vst.msk [vmem:[#allocation2] sm:$0xf] %vm379_vm4, %v377_v35 }
 0x3cc   :  { %v381_v37 = vld [vmem:[#allocation2] sm:$0xf] }
 0x3cd   :  { %v404_v38 = vld [vmem:[#allocation2] sm:$0xf]  ;;  %v388_v39 = vsel %vm387_vm5, %v381_v37, 0.0 }
 0x3ce   :  { %412 = vrot.lane.b32.xlu1 %v404_v38, %s1314_s30  ;;  %390 = vst.msk [vmem:[#allocation3] sm:$0xf] %vm389_vm6, %v388_v39  ;;  %v391_v40 = vld [vmem:[#allocation2] sm:$0xf] }
 0x3d2   :  { %399 = vrot.lane.b32.xlu1 %v391_v40, %s1315_s12 }
 0x3d5   :  { %v418_v51 = vld [vmem:[#allocation3] sm:$0xff] }
 0x440   :  { %v413_v44 = vpop.permute.xlu1 %412 }
 0x441   :  { %v415_v45 = vsel %vm410_vm7, %v413_v44, 0.0 }
 0x442   :  { %416 = vst.msk [vmem:[#allocation3 + $0x10] sm:$0xf] %vm389_vm6, %v415_v45 }
 0x444   :  { %v400_v46 = vpop.permute.xlu1 %399 }
 0x445   :  { %v402_v47 = vsel %vm397_vm8, %v400_v46, 0.0 }
 0x446   :  { %403 = vst.msk [vmem:[#allocation3 + $0x8] sm:$0xf] %vm389_vm6, %v402_v47  ;;  %v944_v47 = vld [vmem:[%s1614_s10] sm:$0xff] }
 0x449   :  { %v420_v48 = vld [vmem:[#allocation3 + $0x10] sm:$0xff] }
 0x44a   :  { %1195 = vmatpush3.msra.mxu1 %v420_v48  ;;  %v1119_v48 = vld [vmem:[%s1609_s5 + $0x3] ss:$0 sm:$0xff] }
 0x44b   :  { %1196 = vmatprep.subr.mxu1 %v1309_v1  ;;  %vm991_vm11 = vcmp.gt.f32.partialorder %v1119_v48, 0.5 }
 0x44d   :  { %v419_v49 = vld [vmem:[#allocation3 + $0x8] sm:$0xff] }
 0x44e   :  { %1197 = vmatpush3.msra.mxu1 %v419_v49  ;;  %v1118_v49 = vld [vmem:[%s1609_s5 + $0x2] ss:$0 sm:$0xff] }
 0x44f   :  { %1198 = vmatprep.subr.mxu1 %v1309_v1  ;;  %vm978_vm12 = vcmp.gt.f32.partialorder %v1118_v49, 0.5 }
 0x450   :  { %1199 = vmatpush3.msra.mxu1 %v418_v51 }
 0x451   :  { %1201 = vmatmul.mubr.msk.f32.vlgmr.msra.gmra.mxu1 %vm425_vm9, %v417_v50  ;;  %1214 = vmatprep.subr.mxu1 %v1309_v1  ;;  %v1117_v50 = vld [vmem:[%s1609_s5 + $0x1] ss:$0 sm:$0xff] }
 0x452   :  { %1216 = vmatprep.mubr.msk.f32.mxu1 %vm1310_vm1, %v1309_v1  ;;  %1215 = vmatpush3.msk.msra.mxu1 %vm132_vm2, %v577_v52  ;;  %vm965_vm13 = vcmp.gt.f32.partialorder %v1117_v50, 0.5 }
 0x453   :  { %1230 = vmatprep.subr.mxu1 %v1309_v1 }
 0x511   :  { %v495_v54 = vpop.f32.mrf.mxu1 }
 0x512   :  { %v496_v55 = vadd.f32 %v495_v54, %v423_v53 }
 0x513   :  { %v1202_v56 = vpop.f32.mrf.mxu1 }
 0x514   :  { %1212 = vmatmul.mubr.msk.f32.vlgmr.msra.gmra.mxu0 %vm39_vm0, %v496_v55 }
 0x515   :  { %1220 = vmatpush3.msra.mxu0 %v1385_v0  ;;  %1227 = vmatprep.mubr.msk.f32.mxu0 %vm1310_vm1, %v1309_v1  ;;  %v1317_v0 = vmov 2  }
 0x516   :  { %1221 = vmatprep.subr.mxu0 %v1309_v1  ;;  %1271 = vset.pattern.permute.xlu1 %v1317_v0 }
 0x517   :  { %1222 = vmatpush3.msra.mxu0 %v1391_v2  ;;  %806 = vperm.xlu1 %1271, %v1472_v14   ;;  %v1318_v2 = vmov 3  }
 0x518   :  { %1223 = vmatprep.subr.mxu0 %v1309_v1 }
 0x519   :  { %1224 = vmatpush3.msra.mxu0 %v1415_v3 }
 0x51a   :  { %1225 = vmatprep.subr.mxu0 %v1309_v1 }
 0x51b   :  { %1226 = vmatpush3.msra.mxu0 %v1424_v4  ;;  %1272 = vset.pattern.permute.xlu1 %v1318_v2 }
 0x51c   :  { %1244 = vmatprep.subr.mxu0 %v1309_v1  ;;  %811 = vperm.xlu1 %1272, %v1472_v14  }
 0x520   :  { %1273 = vset.pattern.permute.xlu1 %v1319_v28 }
 0x592   :  { %v807_v10 = vpop.permute.xlu1 %806 }
 0x597   :  { %v812_v13 = vpop.permute.xlu1 %811 }
 0x5d4   :  { %v572_v57 = vpop.f32.mrf.mxu0 }
 0x5d5   :  { %v576_v58 = vmul.f32 0.0625, %v572_v57 }
 0x5d6   :  { %v1213_v59 = vpop.f32.mrf.mxu0 }
 0x5d7   :  { %1217 = vmatmul.mubr.msk.f32.vlgmr.msra.gmra.mxu1 %vm128_vm3, %v576_v58 }
 0x5d8   :  { %1231 = vmatpush3.msk.msra.mxu1 %vm132_vm2, %v577_v52  ;;  %1232 = vmatprep.mubr.msk.f32.mxu1 %vm1310_vm1, %v1309_v1 }
 0x5d9   :  { %1235 = vmatprep.subr.mxu1 %v1309_v1 }
 0x697   :  { %v650_v60 = vpop.f32.mrf.mxu1 }
 0x698   :  { %v654_v61 = vsub.f32 %v496_v55, %v650_v60  ;;  %v998_v60 = vld [vmem:[%s1613_s9] sm:$0xff] }
 0x699   :  { %v1218_v62 = vpop.f32.mrf.mxu1 }
 0x69a   :  { %v655_v63 = vmul.f32 %v654_v61, %v654_v61 }
 0x69c   :  { %1228 = vmatmul.mubr.msk.f32.vlgmr.msra.gmra.mxu0 %vm39_vm0, %v655_v63 }
 0x69d   :  { %1252 = vmatprep.mubr.msk.f32.mxu0 %vm1310_vm1, %v1309_v1 }
 0x75c   :  { %v725_v3 = vpop.f32.mrf.mxu0 }
 0x75d   :  { %v729_v4 = vmul.f32 0.0625, %v725_v3 }
 0x75e   :  { %v1229_v6 = vpop.f32.mrf.mxu0 }
 0x75f   :  { %1233 = vmatmul.mubr.msk.f32.vlgmr.msra.gmra.mxu1 %vm128_vm3, %v729_v4 }
 0x760   :  { %1241 = vmatprep.mubr.msk.f32.mxu1 %vm1310_vm1, %v1309_v1 }
 0x81f   :  { %v799_v7 = vpop.f32.mrf.mxu1 }
 0x820   :  { %v800_v8 = vadd.f32 1e-05, %v799_v7 }
 0x821   :  { %v1234_v9 = vpop.f32.mrf.mxu1 }
 0x822   :  { %1281 = vrsqrt.f32 %v800_v8 }
 0x82f   :  { %v1282_v11 = vpop.eup %1281 }
 0x830   :  { %v804_v12 = vmul.f32 %v1282_v11, %v654_v61 }
 0x832   :  { %v809_v15 = vmul.f32 %v807_v10, %v804_v12 }
 0x834   :  { %v814_v16 = vadd.f32 %v812_v13, %v809_v15 }
 0x836   :  { %v815_v17 = vsub.f32 0.0, %v814_v16 }
 0x838   :  { %v816_v18 = vmul.f32 1.442695, %v815_v17 }
 0x83a   :  { %1283 = vpow2.f32 %v816_v18 }
 0x847   :  { %v1284_v19 = vpop.eup %1283 }
 0x848   :  { %v818_v20 = vadd.f32 1.0, %v1284_v19 }
 0x84a   :  { %1285 = vrcp.f32 %v818_v20 }
 0x857   :  { %v1286_v21 = vpop.eup %1285 }
 0x858   :  { %v821_v22 = vmul.f32 %v1286_v21, %v814_v16 }
 0x85a   :  { %823 = vrot.lane.b32.xlu0 %v821_v22, %s1313_s6 }
 0x8cc   :  { %v824_v23 = vpop.permute.xlu0 %823 }
 0x8cd   :  { %826 = vst.msk [vmem:[#allocation2] sm:$0xf] %vm379_vm4, %v824_v23 }
 0x8d4   :  { %v849_v24 = vld [vmem:[#allocation2] sm:$0xf] }
 0x8d5   :  { %v836_v25 = vld [vmem:[#allocation2] sm:$0xf]  ;;  %857 = vrot.lane.b32.xlu1 %v849_v24, %s1314_s30 }
 0x8d6   :  { %v827_v26 = vld [vmem:[#allocation2] sm:$0xf]  ;;  %844 = vrot.lane.b32.xlu0 %v836_v25, %s1315_s12 }
 0x8d7   :  { %v834_v27 = vsel %vm387_vm5, %v827_v26, 0.0 }
 0x8d8   :  { %835 = vst.msk [vmem:[#allocation3] sm:$0xf] %vm389_vm6, %v834_v27 }
 0x8d9   :  { %867 = vperm.xlu1 %1273, %v1472_v14   ;;  %v862_v14 = vld [vmem:[%s1612_s8] sm:$0xf]  ;;  %s1320_s8 = smov 125  }
 0x8df   :  { %v863_v35 = vld [vmem:[#allocation3] sm:$0xff] }
 0x947   :  { %v858_v29 = vpop.permute.xlu1 %857 }
 0x948   :  { %v845_v30 = vpop.permute.xlu0 %844  ;;  %v860_v31 = vsel %vm410_vm7, %v858_v29, 0.0 }
 0x949   :  { %v847_v32 = vsel %vm397_vm8, %v845_v30, 0.0  ;;  %861 = vst.msk [vmem:[#allocation3 + $0x10] sm:$0xf] %vm389_vm6, %v860_v31 }
 0x94a   :  { %848 = vst.msk [vmem:[#allocation3 + $0x8] sm:$0xf] %vm389_vm6, %v847_v32 }
 0x950   :  { %v865_v33 = vld [vmem:[#allocation3 + $0x10] sm:$0xff] }
 0x951   :  { %1236 = vmatpush3.msra.mxu1 %v865_v33  ;;  %v864_v34 = vld [vmem:[#allocation3 + $0x8] sm:$0xff] }
 0x952   :  { %1237 = vmatprep.subr.mxu1 %v1309_v1 }
 0x953   :  { %1238 = vmatpush3.msra.mxu1 %v864_v34 }
 0x954   :  { %1239 = vmatprep.subr.mxu1 %v1309_v1  ;;  %v868_v36 = vpop.permute.xlu1 %867 }
 0x955   :  { %1240 = vmatpush3.msra.mxu1 %v863_v35 }
 0x956   :  { %1242 = vmatmul.mubr.msk.f32.vlgmr.msra.gmra.mxu1 %vm425_vm9, %v862_v14 }
 0xa16   :  { %v939_v37 = vpop.f32.mrf.mxu1 }
 0xa17   :  { %v940_v38 = vadd.f32 %v939_v37, %v868_v36 }
 0xa18   :  { %v1243_v39 = vpop.f32.mrf.mxu1 }
 0xa19   :  { %v943_v40 = vadd.f32 %v940_v38, %v1430_v5 }
 0xa1b   :  { %946 = vrot.lane.b32.xlu0 %v943_v40, %s1313_s6  ;;  %s1088_s6 = sshll.u32 %s1321_s27, 4  ;;  %s1089_s6 = int_to_ptr.vmem [resolvable:$true] %s1088_s6 }
 0xa1c   :  { %s1287_s28 = scalar_lea.vmem %s1089_s6, 128  ;;  %p1292_p1 = scmp.lt.s32.totalorder %s1089_s6, %s1089_s6 }
 0xa1d   :  { %p1288_p0 = scmp.ne.s32.totalorder %s1089_s6, %s1287_s28  ;;  %p1293_p2 = scmp.lt.s32.totalorder %s1287_s28, %s1287_s28 }
 0xa1f   :  { %p1294_p3 = por %p1293_p2, %p1292_p1 }
 0xa21   :  { %p1295_p4 = pnand %p1294_p3, %p1288_p0 }
 0xa8d   :  { %v947_v41 = vpop.permute.xlu0 %946 }
 0xa8e   :  { %949 = vst.msk [vmem:[#allocation2] sm:$0xf] %vm379_vm4, %v947_v41 }
 0xa95   :  { %v985_v43 = vld [vmem:[#allocation2] sm:$0xf] }
 0xa96   :  { %v972_v44 = vld [vmem:[#allocation2] sm:$0xf]  ;;  %993 = vrot.lane.b32.xlu1 %v985_v43, %s1320_s8 }
 0xa97   :  { %980 = vrot.lane.b32.xlu0 %v972_v44, %s1314_s30  ;;  %v950_v45 = vld [vmem:[#allocation2] sm:$0xf] }
 0xa98   :  { %v957_v46 = vsel %vm956_vm10, %v950_v45, 0.0  ;;  %v959_v5 = vld [vmem:[#allocation2] sm:$0xf] }
 0xa99   :  { %958 = vst.msk [vmem:[#allocation4] sm:$0xf] %vm389_vm6, %v957_v46 }
 0xa9a   :  { %967 = vrot.lane.b32.xlu1 %v959_v5, %s1315_s12 }
 0xa9b   :  { %1005 = vperm.xlu0 %1274, %v944_v47  }
 0xaa0   :  { %v999_v61 = vld [vmem:[#allocation4] sm:$0xff] }
 0xb08   :  { %v994_v51 = vpop.permute.xlu1 %993 }
 0xb09   :  { %v981_v52 = vpop.permute.xlu0 %980  ;;  %v996_v53 = vsel %vm991_vm11, %v994_v51, 0.0 }
 0xb0a   :  { %v983_v54 = vsel %vm978_vm12, %v981_v52, 0.0  ;;  %997 = vst.msk [vmem:[#allocation4 + $0x18] sm:$0xf] %vm389_vm6, %v996_v53 }
 0xb0b   :  { %984 = vst.msk [vmem:[#allocation4 + $0x10] sm:$0xf] %vm389_vm6, %v983_v54 }
 0xb0c   :  { %v968_v55 = vpop.permute.xlu1 %967 }
 0xb0d   :  { %v970_v56 = vsel %vm965_vm13, %v968_v55, 0.0 }
 0xb0e   :  { %971 = vst.msk [vmem:[#allocation4 + $0x8] sm:$0xf] %vm389_vm6, %v970_v56 }
 0xb11   :  { %v1002_v57 = vld [vmem:[#allocation4 + $0x18] sm:$0xff] }
 0xb12   :  { %1245 = vmatpush3.msra.mxu0 %v1002_v57  ;;  %v1001_v58 = vld [vmem:[#allocation4 + $0x10] sm:$0xff] }
 0xb13   :  { %1246 = vmatprep.subr.mxu0 %v1309_v1 }
 0xb14   :  { %1247 = vmatpush3.msra.mxu0 %v1001_v58 }
 0xb15   :  { %1248 = vmatprep.subr.mxu0 %v1309_v1  ;;  %v1000_v59 = vld [vmem:[#allocation4 + $0x8] sm:$0xff] }
 0xb16   :  { %1249 = vmatpush3.msra.mxu0 %v1000_v59  ;;  %v1006_v62 = vpop.permute.xlu0 %1005 }
 0xb17   :  { %1250 = vmatprep.subr.mxu0 %v1309_v1 }
 0xb18   :  { %1251 = vmatpush3.msra.mxu0 %v999_v61 }
 0xb19   :  { %1253 = vmatmul.mubr.msk.f32.vlgmr.msra.gmra.mxu0 %vm39_vm0, %v998_v60 }
 0xbd9   :  { %v1077_v63 = vpop.f32.mrf.mxu0 }
 0xbda   :  { %v1078_v0 = vadd.f32 %v1077_v63, %v1006_v62 }
 0xbdb   :  { %v1254_v2 = vpop.f32.mrf.mxu0 }
 0xbdc   :  { %1081 = vst.msk [vmem:[#allocation5] sm:$0xff] %vm39_vm0, %v1078_v0 }
 0xbdd   :  { %1298 = shalt.err (!%p1295_p4)
}
 0xbde   :  { %1091 = dma.vmem_to_hbm [thread:$0]  %s1089_s6, 128, %s1615_s11, [#allocation6]  }
 0xbdf   :  { %1307 = dma.done.wait [#allocation6], 128  }
 0xbe0   :  { %1308 = vsyncadd [#allocation6], 4294967168 }
 0xbe1   :  { %1095 = vsyncpa [#allocation6], 1 }

</bundles_post_ra>
